<compile_context>
chip_gen: v6e
topology: v6e:2x2x1
jax: 0.10.0
libtpu: 0.0.40
codegen_flags: <defaults>
</compile_context>

<pallas_src>
import math

import jax
import jax.numpy as jnp
from jax.experimental import pallas as pl
from jax.experimental.pallas import tpu as pltpu


_GELU_INV_SQRT2 = 1.0 / 1.41421  # matches the torch bias_gelu constant exactly


def _linear_bias_gelu_kernel(x_ref, w_ref, b_ref, o_ref, acc_ref):
    # x_ref: (tm, tk), w_ref: (tn, tk)  [native (N,K) layout], b_ref: (1, tn),
    # o_ref: (tm, tn), acc_ref: (tm, tn) f32 scratch resident across the K axis.
    k = pl.program_id(2)

    # MXU matmul with f32 accumulation; contracting dim is the last dim of BOTH
    # operands, i.e. x @ W.T without any wrapper-side transpose.
    prod = jax.lax.dot_general(
        x_ref[...], w_ref[...],
        dimension_numbers=(((1,), (1,)), ((), ())),
        preferred_element_type=jnp.float32)

    @pl.when(k == 0)
    def _():
        acc_ref[...] = prod

    @pl.when(k > 0)
    def _():
        acc_ref[...] += prod

    # Epilogue on the last K step: bias add + exact-erf GELU, cast, store.
    @pl.when(k == pl.num_programs(2) - 1)
    def _():
        z = acc_ref[...] + b_ref[...].astype(jnp.float32)
        g = z * (0.5 * (1.0 + jax.lax.erf(z * _GELU_INV_SQRT2)))
        o_ref[...] = g.astype(o_ref.dtype)


def _round_up(v, m):
    return ((v + m - 1) // m) * m


def _vmem_capacity_bytes():
    try:
        info = pltpu.get_tpu_info()
        cap = int(getattr(info, "vmem_capacity_bytes"))
        if cap > 0:
            return cap
    except Exception:
        pass
    return 64 * 1024 * 1024  # conservative (v7x per-TC) fallback


def linear_activation_gelu(x, weight, bias, *, tm=512, tn=512, tk=1024,
                           mxu_dtype=None):
    """Fused y = gelu(x @ weight.T + bias)  (LinearActivation fused_gelu path).

    x:      (..., in_features)
    weight: (out_features, in_features)  -- consumed in native (N, K) layout
    bias:   (out_features,)
    mxu_dtype: matmul-input dtype. Default (None) selects bf16 when the inputs
               are f32 (2-3x faster MXU on every TPU generation, halves DMA
               bytes); accumulation and the GELU epilogue stay f32.
               Pass jnp.float32 to force full-precision MXU inputs.
    returns (..., out_features) in x.dtype
    """
    out_dtype = x.dtype
    out_features, in_features = weight.shape
    K, N = in_features, out_features
    lead = x.shape[:-1]
    m = 1
    for d in lead:
        m *= d

    if mxu_dtype is None:
        # bf16 MXU inputs by default for f32 data; keep narrower dtypes as-is.
        in_dtype = (jnp.dtype(jnp.bfloat16)
                    if jnp.dtype(out_dtype) == jnp.dtype(jnp.float32)
                    else jnp.dtype(out_dtype))
    else:
        in_dtype = jnp.dtype(mxu_dtype)

    # Sublane alignment for the matmul-input dtype (8 for 4-byte, 16 for 2-byte).
    sub = 8 if in_dtype.itemsize >= 4 else (16 if in_dtype.itemsize == 2 else 32)

    # Clamp tile sizes to the (padded) problem size and hardware alignment.
    #   tm: sublane axis of x/out blocks; tn, tk: lane axes -> multiples of 128.
    tm_e = _round_up(max(1, min(tm, _round_up(m, sub))), sub)
    tn_e = _round_up(max(1, min(tn, _round_up(N, 128))), 128)
    tk_e = _round_up(max(1, min(tk, _round_up(K, 128))), 128)

    m_pad = _round_up(m, tm_e)
    n_pad = _round_up(N, tn_e)
    k_pad = _round_up(K, tk_e)

    # v7x has 2 TensorCores that shard "parallel" grid axes: make sure the
    # parallel (M, N) part of the grid has at least 2 blocks when possible.
    if (m_pad // tm_e) * (n_pad // tn_e) == 1:
        if n_pad >= 256:
            tn_e = _round_up((n_pad + 1) // 2, 128)
            n_pad = _round_up(N, tn_e)
        elif m_pad >= 2 * sub:
            tm_e = _round_up((m_pad + 1) // 2, sub)
            m_pad = _round_up(m, tm_e)

    x2d = x.reshape(m, K).astype(in_dtype)
    w2d = weight.astype(in_dtype)              # native (N, K): no transpose pass
    b2d = bias.reshape(1, N).astype(jnp.float32)

    # Zero-pad to tile multiples; zeros contribute nothing to the matmul and
    # padded output rows/cols are sliced off below (gelu(0)=0 in padded cols).
    if (m_pad, k_pad) != (m, K):
        x2d = jnp.pad(x2d, ((0, m_pad - m), (0, k_pad - K)))
    if (n_pad, k_pad) != (N, K):
        w2d = jnp.pad(w2d, ((0, n_pad - N), (0, k_pad - K)))
    if n_pad != N:
        b2d = jnp.pad(b2d, ((0, 0), (0, n_pad - N)))

    grid = (m_pad // tm_e, n_pad // tn_e, k_pad // tk_e)

    # VMEM budget: double-buffered x/w/out tiles + f32 accumulator + bias.
    in_bytes = in_dtype.itemsize
    out_bytes = jnp.dtype(out_dtype).itemsize
    vmem_est = (2 * (tm_e * tk_e + tn_e * tk_e) * in_bytes
                + 2 * tm_e * tn_e * out_bytes
                + tm_e * tn_e * 4
                + 2 * tn_e * 4)
    vmem_cap = int(0.85 * _vmem_capacity_bytes())
    vmem_limit = max(int(1.2 * vmem_est), 32 * 1024 * 1024)
    vmem_limit = min(vmem_limit, vmem_cap)
    vmem_limit = max(vmem_limit, vmem_est)     # never below the real working set

    out = pl.pallas_call(
        _linear_bias_gelu_kernel,
        out_shape=jax.ShapeDtypeStruct((m_pad, n_pad), out_dtype),
        grid_spec=pltpu.PrefetchScalarGridSpec(
            num_scalar_prefetch=0,
            grid=grid,
            in_specs=[
                pl.BlockSpec((tm_e, tk_e), lambda i, j, k: (i, k)),   # x tile
                pl.BlockSpec((tn_e, tk_e), lambda i, j, k: (j, k)),   # W tile (N,K)
                pl.BlockSpec((1, tn_e), lambda i, j, k: (0, j)),      # bias tile
            ],
            out_specs=pl.BlockSpec((tm_e, tn_e), lambda i, j, k: (i, j)),
            scratch_shapes=[pltpu.VMEM((tm_e, tn_e), jnp.float32)],
        ),
        compiler_params=pltpu.CompilerParams(
            dimension_semantics=("parallel", "parallel", "arbitrary"),
            vmem_limit_bytes=vmem_limit,
        ),
    )(x2d, w2d, b2d)

    out = out[:m, :N]
    return out.reshape(*lead, N)


def init_params(key, in_features, out_features):
    """Deterministic init matching nn.Linear / kaiming_uniform_(a=sqrt(5))."""
    kw, kb = jax.random.split(key)
    w_bound = math.sqrt(1.0 / in_features)   # kaiming_uniform with a=sqrt(5)
    weight = jax.random.uniform(
        kw, (out_features, in_features), jnp.float32, -w_bound, w_bound)
    b_bound = 1.0 / math.sqrt(in_features)
    bias = jax.random.uniform(
        kb, (out_features,), jnp.float32, -b_bound, b_bound)
    return weight, bias


if __name__ == "__main__":
    key = jax.random.PRNGKey(0)
    k_x, k_p, k_x2, k_p2 = jax.random.split(key, 4)

    def ref_bias_gelu(x, w, b):
        z = x @ w.T + b
        return z * 0.5 * (1.0 + jax.lax.erf(z / 1.41421))

    # --- small shape consistent with the module ---
    batch, seq, in_f, out_f = 2, 8, 32, 32
    x = jax.random.normal(k_x, (batch, seq, in_f), jnp.float32)
    w, b = init_params(k_p, in_f, out_f)
    ref = ref_bias_gelu(x, w, b)

    # Default path: bf16 MXU inputs, f32 accumulation -> looser tolerance.
    y = jax.block_until_ready(linear_activation_gelu(x, w, b))
    assert y.shape == (batch, seq, out_f)
    assert jnp.allclose(y, ref, atol=2e-2, rtol=2e-2), "mismatch vs reference (default bf16)"

    # Forced-f32 MXU path -> tight tolerance.
    y_f32 = jax.block_until_ready(
        linear_activation_gelu(x, w, b, mxu_dtype=jnp.float32))
    assert jnp.allclose(y_f32, ref, atol=1e-5, rtol=1e-5), "mismatch vs reference (f32)"

    # --- non-divisible shapes exercising M/N/K tiling, padding, accumulator ---
    batch2, seq2, in_f2, out_f2 = 2, 24, 160, 136
    x2 = jax.random.normal(k_x2, (batch2, seq2, in_f2), jnp.float32)
    w2, b2 = init_params(k_p2, in_f2, out_f2)
    ref2 = ref_bias_gelu(x2, w2, b2)

    # Multi-tile grid (3 x 2 x 2) with explicit small tiles, forced f32.
    y2 = jax.block_until_ready(
        linear_activation_gelu(x2, w2, b2, tm=16, tn=128, tk=128,
                               mxu_dtype=jnp.float32))
    assert y2.shape == (batch2, seq2, out_f2)
    assert jnp.allclose(y2, ref2, atol=1e-5, rtol=1e-5), "mismatch vs reference (tiled f32)"

    # Default tiles + default bf16 (also exercises the 2-TensorCore N split).
    y2_bf16 = jax.block_until_ready(linear_activation_gelu(x2, w2, b2))
    assert y2_bf16.shape == (batch2, seq2, out_f2)
    assert jnp.allclose(y2_bf16, ref2, atol=3e-2, rtol=3e-2), "mismatch vs reference (bf16)"

    print("KERNEL_OK")
</pallas_src>

<mosaic_0001>
module attributes {stable_mosaic.version = 11 : i64} {
  func.func @_linear_bias_gelu_kernel(%arg0: i32, %arg1: i32, %arg2: i32, %arg3: memref<16x128xbf16, #tpu.memory_space<vmem>>, %arg4: memref<128x128xbf16, #tpu.memory_space<vmem>>, %arg5: memref<1x128xf32, #tpu.memory_space<vmem>>, %arg6: memref<16x128xf32, #tpu.memory_space<vmem>>, %arg7: memref<16x128xf32, #tpu.memory_space<vmem>>) attributes {dimension_semantics = [#tpu.dimension_semantics<parallel>, #tpu.dimension_semantics<parallel>, #tpu.dimension_semantics<arbitrary>], iteration_bounds = array<i64: 1, 1, 1>, scalar_prefetch = 0 : i64, scratch_operands = 1 : i64, tpu.core_type = #tpu.core_type<tc>, window_params = [{transform_indices = @transform_0, window_bounds = array<i64: 16, 128>}, {transform_indices = @transform_1, window_bounds = array<i64: 128, 128>}, {transform_indices = @transform_2, window_bounds = array<i64: 1, 128>}, {transform_indices = @transform_3, window_bounds = array<i64: 16, 128>}]} {
    %c0 = arith.constant 0 : index
    %c0_0 = arith.constant 0 : index
    %0 = vector.load %arg3[%c0, %c0_0] : memref<16x128xbf16, #tpu.memory_space<vmem>>, vector<16x128xbf16>
    %c0_1 = arith.constant 0 : index
    %c0_2 = arith.constant 0 : index
    %1 = vector.load %arg4[%c0_1, %c0_2] : memref<128x128xbf16, #tpu.memory_space<vmem>>, vector<128x128xbf16>
    %cst = arith.constant dense<0.000000e+00> : vector<16x128xf32>
    %2 = tpu.matmul %0, %1, %cst {dimension_numbers = #tpu.dot_dimension_numbers<[1], [1], [0], [0], [0, 0, 1, 0], [], []>} : vector<16x128xbf16>, vector<128x128xbf16>, vector<16x128xf32> -> vector<16x128xf32>
    %c0_i32 = arith.constant 0 : i32
    %3 = arith.cmpi eq, %arg2, %c0_i32 : i32
    %4 = arith.extui %3 : i1 to i32
    %c0_i32_3 = arith.constant 0 : i32
    %5 = arith.cmpi ne, %4, %c0_i32_3 : i32
    scf.if %5 {
      %c0_8 = arith.constant 0 : index
      %c0_9 = arith.constant 0 : index
      %12 = vector.load %arg7[%c0_8, %c0_9] : memref<16x128xf32, #tpu.memory_space<vmem>>, vector<16x128xf32>
      tpu.vector_store %arg7[%c0_8, %c0_9], %2 {strides = array<i32>} : memref<16x128xf32, #tpu.memory_space<vmem>>, vector<16x128xf32>,
    } else {
    }
    %c0_i32_4 = arith.constant 0 : i32
    %6 = arith.cmpi sgt, %arg2, %c0_i32_4 : i32
    %7 = arith.extui %6 : i1 to i32
    %c0_i32_5 = arith.constant 0 : i32
    %8 = arith.cmpi ne, %7, %c0_i32_5 : i32
    scf.if %8 {
      %c0_8 = arith.constant 0 : index
      %c0_9 = arith.constant 0 : index
      %12 = vector.load %arg7[%c0_8, %c0_9] : memref<16x128xf32, #tpu.memory_space<vmem>>, vector<16x128xf32>
      %13 = arith.addf %12, %2 : vector<16x128xf32>
      %c0_10 = arith.constant 0 : index
      %c0_11 = arith.constant 0 : index
      %14 = vector.load %arg7[%c0_10, %c0_11] : memref<16x128xf32, #tpu.memory_space<vmem>>, vector<16x128xf32>
      tpu.vector_store %arg7[%c0_10, %c0_11], %13 {strides = array<i32>} : memref<16x128xf32, #tpu.memory_space<vmem>>, vector<16x128xf32>,
    } else {
    }
    %c0_i32_6 = arith.constant 0 : i32
    %9 = arith.cmpi eq, %arg2, %c0_i32_6 : i32
    %10 = arith.extui %9 : i1 to i32
    %c0_i32_7 = arith.constant 0 : i32
    %11 = arith.cmpi ne, %10, %c0_i32_7 : i32
    scf.if %11 {
      %c0_8 = arith.constant 0 : index
      %c0_9 = arith.constant 0 : index
      %12 = vector.load %arg7[%c0_8, %c0_9] : memref<16x128xf32, #tpu.memory_space<vmem>>, vector<16x128xf32>
      %c0_10 = arith.constant 0 : index
      %c0_11 = arith.constant 0 : index
      %13 = vector.load %arg5[%c0_10, %c0_11] : memref<1x128xf32, #tpu.memory_space<vmem>>, vector<1x128xf32>
      %14 = vector.broadcast %13 : vector<1x128xf32> to vector<16x128xf32>
      %15 = arith.addf %12, %14 : vector<16x128xf32>
      %cst_12 = arith.constant 0.707108557 : f32
      %16 = vector.broadcast %cst_12 : f32 to vector<16x128xf32>
      %17 = arith.mulf %15, %16 : vector<16x128xf32>
      %18 = math.erf %17 : vector<16x128xf32>
      %cst_13 = arith.constant 1.000000e+00 : f32
      %19 = vector.broadcast %cst_13 : f32 to vector<16x128xf32>
      %20 = arith.addf %19, %18 : vector<16x128xf32>
      %cst_14 = arith.constant 5.000000e-01 : f32
      %21 = vector.broadcast %cst_14 : f32 to vector<16x128xf32>
      %22 = arith.mulf %21, %20 : vector<16x128xf32>
      %23 = arith.mulf %15, %22 : vector<16x128xf32>
      %c0_15 = arith.constant 0 : index
      %c0_16 = arith.constant 0 : index
      %24 = vector.load %arg6[%c0_15, %c0_16] : memref<16x128xf32, #tpu.memory_space<vmem>>, vector<16x128xf32>
      tpu.vector_store %arg6[%c0_15, %c0_16], %23 {strides = array<i32>} : memref<16x128xf32, #tpu.memory_space<vmem>>, vector<16x128xf32>,
    } else {
    }
    return
  }
  func.func @transform_0(%arg0: i32, %arg1: i32, %arg2: i32) -> (i32, i32) {
    %c0_i32 = arith.constant 0 : i32
    return %arg0, %arg2 : i32, i32
  }
  func.func @transform_1(%arg0: i32, %arg1: i32, %arg2: i32) -> (i32, i32) {
    %c0_i32 = arith.constant 0 : i32
    return %arg1, %arg2 : i32, i32
  }
  func.func @transform_2(%arg0: i32, %arg1: i32, %arg2: i32) -> (i32, i32) {
    %c0_i32 = arith.constant 0 : i32
    %c0_i32_0 = arith.constant 0 : i32
    return %c0_i32, %arg1 : i32, i32
  }
  func.func @transform_3(%arg0: i32, %arg1: i32, %arg2: i32) -> (i32, i32) {
    %c0_i32 = arith.constant 0 : i32
    return %arg0, %arg1 : i32, i32
  }
}

</mosaic_0001>

<bundles_post_ra>
// kernel: tpu_custom_call.1
= control target key start
LH: loop header
LB: loop body
LE: loop exit
PB: predicated region body
PF: predicated region fallthrough
CT: control target
= control target key end

     0   :  { %8 = vsyncpa [#allocation4], 0  ;;  %s385_s0 = inlined_call_operand.hbm [shape: bf16[16,128], index: 0, kind: input, shape index: {}]   ;;  %s386_s1 = inlined_call_operand.hbm [shape: bf16[128,128], index: 1, kind: input, shape index: {}]   ;;  %s387_s2 = inlined_call_operand.vmem [shape: f32[1,128], index: 2, kind: input, shape index: {}]   ;;  %s388_s3 = inlined_call_operand.hbm [shape: f32[16,128], index: 3, kind: output, shape index: {}]  }
   0x1   :  { %9 = vsyncpa [#allocation7], 0 }
   0x2   :  { %10 = vsyncpa [#allocation5], 0  ;;  %s344_s12 = smov [#allocation3]  }
   0x3   :  { %s16_s13 = sshll.u32 %s344_s12, 4  ;;  %s17_s13 = int_to_ptr.vmem [resolvable:$true] %s16_s13 }
   0x4   :  { %s286_s14 = scalar_lea.vmem %s17_s13, 128  ;;  %p291_p1 = scmp.lt.s32.totalorder %s17_s13, %s17_s13 }
   0x5   :  { %p287_p0 = scmp.ne.s32.totalorder %s17_s13, %s286_s14  ;;  %p292_p2 = scmp.lt.s32.totalorder %s286_s14, %s286_s14 }
   0x7   :  { %p293_p3 = por %p292_p2, %p291_p1 }
   0x9   :  { %p294_p4 = pnand %p293_p3, %p287_p0 }
   0xb   :  { %297 = shalt.err (!%p294_p4)
}
   0xc   :  { %s345_s15 = smov 64   ;;  %s346_s16 = smov 4  }
   0xd   :  { %22 = dma.hbm_to_vmem [thread:$0]  %s385_s0, 128, %s17_s13, [#allocation4], %s345_s15, %s345_s15, %s346_s16  }
   0xe   :  { %s347_s19 = smov [#allocation6]  }
   0xf   :  { %s28_s20 = sshll.u32 %s347_s19, 4  ;;  %s29_s20 = int_to_ptr.vmem [resolvable:$true] %s28_s20 }
  0x10   :  { %s306_s21 = scalar_lea.vmem %s29_s20, 1024  ;;  %p311_p6 = scmp.lt.s32.totalorder %s29_s20, %s29_s20 }
  0x11   :  { %p307_p5 = scmp.ne.s32.totalorder %s29_s20, %s306_s21  ;;  %p312_p7 = scmp.lt.s32.totalorder %s306_s21, %s306_s21 }
  0x13   :  { %p313_p8 = por %p312_p7, %p311_p6 }
  0x15   :  { %p314_p9 = pnand %p313_p8, %p307_p5 }
  0x17   :  { %317 = shalt.err (!%p314_p9)
}
  0x18   :  { %34 = dma.hbm_to_vmem [thread:$0]  %s386_s1, 1024, %s29_s20, [#allocation7], %s345_s15, %s345_s15, %s346_s16  }
  0x19   :  { %338 = dma.done.wait [#allocation4], 128  }
  0x1a   :  { %339 = vsyncadd [#allocation4], 4294967168 }
  0x1b   :  { %340 = dma.done.wait [#allocation7], 1024  }
  0x1c   :  { %341 = vsyncadd [#allocation7], 4294966272  ;;  %v348_v0 = vmov 0.0   ;;  %vm349_vm0 = vmmov 0   ;;  %v265_v1 = vld [vmem:[#allocation6 + $0x38] sm:$0xff]   ;;  %v266_v2 = vld [vmem:[#allocation6 + $0x30] sm:$0xff]  }
  0x1d   :  { %236 = vmatprep.subr.bf16.mxu0 %v348_v0  ;;  %252 = vmatprep.mubr.msk.bf16.mxu0 %vm349_vm0, %v348_v0  ;;  %v267_v3 = vld [vmem:[#allocation6 + $0x28] sm:$0xff]   ;;  %v268_v4 = vld [vmem:[#allocation6 + $0x20] sm:$0xff]   ;;  %v269_v5 = vld [vmem:[#allocation6 + $0x18] sm:$0xff]   ;;  %s350_s24 = smov [#allocation8]  }
  0x1e   :  { %237 = vmatpush3.bf16.xpose.msra.mxu0 %v265_v1  ;;  %v270_v6 = vld [vmem:[#allocation6 + $0x10] sm:$0xff]   ;;  %v271_v7 = vld [vmem:[#allocation6 + $0x8] sm:$0xff]   ;;  %v272_v8 = vld [vmem:[#allocation6] sm:$0xff]   ;;  %s204_s25 = sshll.u32 %s350_s24, 4  ;;  %s205_s25 = int_to_ptr.vmem [resolvable:$true] %s204_s25 }
  0x1f   :  { %238 = vmatprep.subr.bf16.mxu0 %v348_v0  ;;  %v273_v9 = vld [vmem:[#allocation3] sm:$0xff]   ;;  %p323_p11 = scmp.lt.s32.totalorder %s205_s25, %s205_s25 }
  0x20   :  { %v226_v10 = vld [vmem:[%s387_s2] ss:$0 sm:$0xff]  ;;  %s318_s2 = scalar_lea.vmem %s205_s25, 256 }
  0x21   :  { %p319_p10 = scmp.ne.s32.totalorder %s205_s25, %s318_s2  ;;  %p324_p12 = scmp.lt.s32.totalorder %s318_s2, %s318_s2 }
  0x23   :  { %p325_p13 = por %p324_p12, %p323_p11 }
  0x25   :  { %p326_p0 = pnand %p325_p13, %p319_p10 }
  0x26   :  { %239 = vmatpush3.bf16.xpose.msra.mxu0 %v266_v2 }
  0x27   :  { %240 = vmatprep.subr.bf16.mxu0 %v348_v0 }
  0x2e   :  { %241 = vmatpush3.bf16.xpose.msra.mxu0 %v267_v3 }
  0x2f   :  { %242 = vmatprep.subr.bf16.mxu0 %v348_v0 }
  0x36   :  { %243 = vmatpush3.bf16.xpose.msra.mxu0 %v268_v4 }
  0x37   :  { %244 = vmatprep.subr.bf16.mxu0 %v348_v0 }
  0x3e   :  { %245 = vmatpush3.bf16.xpose.msra.mxu0 %v269_v5 }
  0x3f   :  { %246 = vmatprep.subr.bf16.mxu0 %v348_v0 }
  0x46   :  { %247 = vmatpush3.bf16.xpose.msra.mxu0 %v270_v6 }
  0x47   :  { %248 = vmatprep.subr.bf16.mxu0 %v348_v0 }
  0x4e   :  { %249 = vmatpush3.bf16.xpose.msra.mxu0 %v271_v7 }
  0x4f   :  { %250 = vmatprep.subr.bf16.mxu0 %v348_v0 }
  0x56   :  { %251 = vmatpush3.bf16.xpose.msra.mxu0 %v272_v8 }
  0x5d   :  { %253 = vmatmul.mubr.bf16.vlgmr.msra.gmra.mxu0 %v273_v9 }
 0x11d   :  { %v150_v11 = vpop.f32.mrf.mxu0 }
 0x11e   :  { %v185_v12 = vadd.f32 %v226_v10, %v150_v11 }
 0x11f   :  { %v254_v13 = vpop.f32.mrf.mxu0 }
 0x120   :  { %v187_v14 = vmul.f32 0.70710856, %v185_v12 }
 0x121   :  { %v153_v15 = vpop.f32.mrf.mxu0 }
 0x122   :  { %274 = verf.f32 %v187_v14  ;;  %v186_v16 = vadd.f32 %v226_v10, %v153_v15 }
 0x123   :  { %v255_v17 = vpop.f32.mrf.mxu0 }
 0x124   :  { %v188_v18 = vmul.f32 0.70710856, %v186_v16 }
 0x126   :  { %276 = verf.f32 %v188_v18 }
 0x12f   :  { %v275_v19 = vpop.eup %274 }
 0x130   :  { %v191_v20 = vadd.f32 1.0, %v275_v19 }
 0x132   :  { %v193_v21 = vmul.f32 0.5, %v191_v20 }
 0x133   :  { %v277_v22 = vpop.eup %276 }
 0x134   :  { %v195_v23 = vmul.f32 %v193_v21, %v185_v12  ;;  %v192_v24 = vadd.f32 1.0, %v277_v22 }
 0x136   :  { %197 = vst [vmem:[#allocation8] sm:$0xff] %v195_v23  ;;  %v194_v25 = vmul.f32 0.5, %v192_v24 }
 0x138   :  { %v196_v26 = vmul.f32 %v194_v25, %v186_v16 }
 0x13a   :  { %198 = vst [vmem:[#allocation8 + $0x8] sm:$0xff] %v196_v26 }
 0x13b   :  { %329 = shalt.err (!%p326_p0)
}
 0x13c   :  { %s351_s26 = smov 128   ;;  %s352_s27 = smov 8  }
 0x13d   :  { %210 = dma.vmem_to_hbm [thread:$0]  %s205_s25, 256, %s388_s3, [#allocation5], %s351_s26, %s351_s26, %s352_s27  }
 0x13e   :  { %342 = dma.done.wait [#allocation5], 256  }
 0x13f   :  { %343 = vsyncadd [#allocation5], 4294967040 }
 0x140   :  { %214 = vsyncpa [#allocation4], 1 }
 0x141   :  { %215 = vsyncpa [#allocation7], 1 }
 0x142   :  { %216 = vsyncpa [#allocation5], 1 }

</bundles_post_ra>
